<compile_context>
chip_gen: v7x
topology: tpu7x:2x2x1
jax: 0.10.0
libtpu: 0.0.40
codegen_flags: <defaults>
</compile_context>

<pallas_src>
import jax
import jax.numpy as jnp
from jax.experimental import pallas as pl
from jax.experimental.pallas import tpu as pltpu

LANE = 128
NEG_BIG = -1e30  # bias for padded class lanes -> excluded from log_softmax


# ----------------------------- Pallas kernel ------------------------------- #

def fused_gcn_kernel(x_ref, adj_ref, w1_ref, b1_ref, w2_ref, b2_ref,
                     o_ref, h_ref):
    """Fused 2-hop GCN + log_softmax.

    x_ref, adj_ref, w1_ref, w2_ref : matmul operands (bf16 or f32), lane-dense.
    b1_ref, b2_ref                 : (1, F) f32 biases (b2 padded with -1e30).
    o_ref                          : (N_pad, C_pad) f32 log-probabilities.
    h_ref                          : VMEM scratch for the hidden activations
                                     (keeps h on-chip; no HBM round trip).
    """
    cdt = x_ref.dtype  # matmul operand dtype (bf16 fast path or f32)

    # ---- hop 1: h = relu(adj @ (x @ W1) + b1) ------------------------------
    support1 = jnp.dot(x_ref[...], w1_ref[...],
                       preferred_element_type=jnp.float32)          # (N, H) f32
    z1 = jnp.dot(adj_ref[...], support1.astype(cdt),
                 preferred_element_type=jnp.float32) + b1_ref[...]  # (N, H) f32
    h_ref[...] = jnp.maximum(z1, 0.0)                               # f32 in VMEM

    # ---- dropout: identity in eval mode ------------------------------------

    # ---- hop 2: logits = adj @ (h @ W2) + b2 --------------------------------
    support2 = jnp.dot(h_ref[...].astype(cdt), w2_ref[...],
                       preferred_element_type=jnp.float32)          # (N, C) f32
    logits = jnp.dot(adj_ref[...], support2.astype(cdt),
                     preferred_element_type=jnp.float32) + b2_ref[...]

    # ---- log_softmax over the (padded) class dim ----------------------------
    # Padded class lanes have logits ~ -1e30 -> exp() == 0, so they do not
    # perturb the normalizer.
    m = jnp.max(logits, axis=-1, keepdims=True)
    shifted = logits - m
    lse = jnp.log(jnp.sum(jnp.exp(shifted), axis=-1, keepdims=True))
    o_ref[...] = (shifted - lse).astype(o_ref.dtype)


# ------------------------------ JAX wrapper --------------------------------- #

def _round_up(n, m=LANE):
    return ((n + m - 1) // m) * m


def _pad_to(x, shape):
    return jnp.pad(x, [(0, t - s) for s, t in zip(x.shape, shape)])


def graph_clf_forward(params, node_features, adj, *, matmul_dtype=jnp.bfloat16):
    """GraphClf.forward: node_vec = PivotGCN(node_features, adj)."""
    n, nfeat = node_features.shape
    hidden = params["w1"].shape[1]
    nclass = params["w2"].shape[1]

    # Lane-dense padded dims (multiples of 128).
    n_p = _round_up(n)
    f_p = _round_up(nfeat)
    h_p = _round_up(hidden)
    c_p = _round_up(nclass)

    # Matmul operands in bf16 (f32 accumulate inside the kernel); biases in f32.
    x_p = _pad_to(node_features, (n_p, f_p)).astype(matmul_dtype)
    adj_p = _pad_to(adj, (n_p, n_p)).astype(matmul_dtype)
    w1_p = _pad_to(params["w1"], (f_p, h_p)).astype(matmul_dtype)
    w2_p = _pad_to(params["w2"], (h_p, c_p)).astype(matmul_dtype)
    b1_p = _pad_to(params["b1"].reshape(1, -1), (1, h_p)).astype(jnp.float32)
    b2_p = jnp.full((1, c_p), NEG_BIG, jnp.float32).at[:, :nclass].set(
        params["b2"].astype(jnp.float32))

    operands = (x_p, adj_p, w1_p, b1_p, w2_p, b2_p)

    flops = 2 * n_p * h_p * (f_p + n_p) + 2 * n_p * c_p * (h_p + n_p)
    transcendentals = n_p * c_p + n_p  # exp per logit + log per row
    bytes_accessed = (sum(int(a.size) * a.dtype.itemsize for a in operands)
                      + n_p * c_p * 4)

    vmem_spec = pl.BlockSpec(memory_space=pltpu.MemorySpace.VMEM)

    out_p = pl.pallas_call(
        fused_gcn_kernel,
        out_shape=jax.ShapeDtypeStruct((n_p, c_p), jnp.float32),
        in_specs=[vmem_spec] * len(operands),
        out_specs=vmem_spec,
        scratch_shapes=[pltpu.VMEM((n_p, h_p), jnp.float32)],  # hidden layer h
        compiler_params=pltpu.CompilerParams(
            vmem_limit_bytes=32 * 1024 * 1024),
        cost_estimate=pl.CostEstimate(
            flops=int(flops),
            transcendentals=int(transcendentals),
            bytes_accessed=int(bytes_accessed)),
    )(*operands)

    return out_p[:n, :nclass]


# ----------------------------- Param init / ref ----------------------------- #

def init_params(key, nfeat, hidden, nclass):
    k = jax.random.split(key, 6)
    scale1 = 1.0 / jnp.sqrt(nfeat)
    scale2 = 1.0 / jnp.sqrt(hidden)
    return {
        # GCN hop 1: nfeat -> hidden
        "w1": jax.random.uniform(k[0], (nfeat, hidden), jnp.float32, -scale1, scale1),
        "b1": jax.random.uniform(k[1], (hidden,), jnp.float32, -scale1, scale1),
        # GCN hop 2: hidden -> nclass
        "w2": jax.random.uniform(k[2], (hidden, nclass), jnp.float32, -scale2, scale2),
        "b2": jax.random.uniform(k[3], (nclass,), jnp.float32, -scale2, scale2),
        # feature_extractor Linear (declared in __init__ but unused in forward)
        "fe_w": jax.random.uniform(k[4], (nfeat, hidden), jnp.float32, -scale1, scale1),
        "fe_b": jax.random.uniform(k[5], (hidden,), jnp.float32, -scale1, scale1),
    }


def reference_forward(params, x, adj, matmul_dtype=jnp.float32):
    """Pure-JAX reference with the same matmul-operand dtype / f32 accumulate."""
    def mm(a, b):
        return jnp.dot(a.astype(matmul_dtype), b.astype(matmul_dtype),
                       preferred_element_type=jnp.float32)
    h = jnp.maximum(mm(adj, mm(x, params["w1"])) + params["b1"], 0.0)
    logits = mm(adj, mm(h, params["w2"])) + params["b2"]
    return jax.nn.log_softmax(logits, axis=-1)


# ----------------------------------- main ----------------------------------- #

if __name__ == "__main__":
    key = jax.random.PRNGKey(0)
    k_x, k_a, k_p = jax.random.split(key, 3)

    # Small shapes consistent with the module's config:
    #   num_nodes=16, num_feat=32, hidden_size=16, num_class=8, graph_hops=2
    N, NFEAT, HIDDEN, NCLASS = 16, 32, 16, 8

    node_features = jax.random.normal(k_x, (N, NFEAT), jnp.float32)

    # Symmetric row-normalized adjacency with self-loops (typical GCN input).
    a_raw = (jax.random.uniform(k_a, (N, N)) > 0.7).astype(jnp.float32)
    a_sym = jnp.maximum(a_raw, a_raw.T) + jnp.eye(N, dtype=jnp.float32)
    deg = jnp.sum(a_sym, axis=-1, keepdims=True)
    adj = a_sym / deg

    params = init_params(k_p, NFEAT, HIDDEN, NCLASS)

    ref_f32 = reference_forward(params, node_features, adj, jnp.float32)

    # f32 MXU-operand path: matches the f32 reference tightly.
    out_f32 = jax.block_until_ready(
        graph_clf_forward(params, node_features, adj, matmul_dtype=jnp.float32))
    assert out_f32.shape == (N, NCLASS)
    assert jnp.allclose(out_f32, ref_f32, atol=1e-5, rtol=1e-5)

    # bf16 MXU-operand path (v5e/v6e/v7x fast path), f32 accumulate + softmax.
    out_bf16 = jax.block_until_ready(
        graph_clf_forward(params, node_features, adj, matmul_dtype=jnp.bfloat16))
    assert out_bf16.shape == (N, NCLASS)
    ref_bf16 = reference_forward(params, node_features, adj, jnp.bfloat16)
    assert jnp.allclose(out_bf16, ref_bf16, atol=1e-4, rtol=1e-4)
    assert jnp.allclose(out_bf16, ref_f32, atol=1e-1)  # bf16-operand tolerance

    print("KERNEL_OK")
</pallas_src>

<mosaic_0001>
module attributes {stable_mosaic.version = 11 : i64} {
  func.func @fused_gcn_kernel(%arg0: memref<128x128xf32, #tpu.memory_space<vmem>>, %arg1: memref<128x128xf32, #tpu.memory_space<vmem>>, %arg2: memref<128x128xf32, #tpu.memory_space<vmem>>, %arg3: memref<1x128xf32, #tpu.memory_space<vmem>>, %arg4: memref<128x128xf32, #tpu.memory_space<vmem>>, %arg5: memref<1x128xf32, #tpu.memory_space<vmem>>, %arg6: memref<128x128xf32, #tpu.memory_space<vmem>>, %arg7: memref<128x128xf32, #tpu.memory_space<vmem>>) attributes {dimension_semantics = [], scalar_prefetch = 0 : i64, scratch_operands = 1 : i64, tpu.core_type = #tpu.core_type<tc>} {
    %c0 = arith.constant 0 : index
    %c0_0 = arith.constant 0 : index
    %0 = vector.load %arg0[%c0, %c0_0] : memref<128x128xf32, #tpu.memory_space<vmem>>, vector<128x128xf32>
    %c0_1 = arith.constant 0 : index
    %c0_2 = arith.constant 0 : index
    %1 = vector.load %arg2[%c0_1, %c0_2] : memref<128x128xf32, #tpu.memory_space<vmem>>, vector<128x128xf32>
    %cst = arith.constant dense<0.000000e+00> : vector<128x128xf32>
    %2 = tpu.matmul %0, %1, %cst {dimension_numbers = #tpu.dot_dimension_numbers<[1], [0], [0], [1], [0, 0, 1, 1], [], []>} : vector<128x128xf32>, vector<128x128xf32>, vector<128x128xf32> -> vector<128x128xf32>
    %c0_3 = arith.constant 0 : index
    %c0_4 = arith.constant 0 : index
    %3 = vector.load %arg1[%c0_3, %c0_4] : memref<128x128xf32, #tpu.memory_space<vmem>>, vector<128x128xf32>
    %cst_5 = arith.constant dense<0.000000e+00> : vector<128x128xf32>
    %4 = tpu.matmul %3, %2, %cst_5 {dimension_numbers = #tpu.dot_dimension_numbers<[1], [0], [0], [1], [0, 0, 1, 1], [], []>} : vector<128x128xf32>, vector<128x128xf32>, vector<128x128xf32> -> vector<128x128xf32>
    %c0_6 = arith.constant 0 : index
    %c0_7 = arith.constant 0 : index
    %5 = vector.load %arg3[%c0_6, %c0_7] : memref<1x128xf32, #tpu.memory_space<vmem>>, vector<1x128xf32>
    %6 = vector.broadcast %5 : vector<1x128xf32> to vector<128x128xf32>
    %7 = arith.addf %4, %6 : vector<128x128xf32>
    %cst_8 = arith.constant 0.000000e+00 : f32
    %8 = vector.broadcast %cst_8 : f32 to vector<128x128xf32>
    %9 = arith.maximumf %7, %8 : vector<128x128xf32>
    %c0_9 = arith.constant 0 : index
    %c0_10 = arith.constant 0 : index
    %10 = vector.load %arg7[%c0_9, %c0_10] : memref<128x128xf32, #tpu.memory_space<vmem>>, vector<128x128xf32>
    tpu.vector_store %arg7[%c0_9, %c0_10], %9 {strides = array<i32>} : memref<128x128xf32, #tpu.memory_space<vmem>>, vector<128x128xf32>,
    %c0_11 = arith.constant 0 : index
    %c0_12 = arith.constant 0 : index
    %11 = vector.load %arg7[%c0_11, %c0_12] : memref<128x128xf32, #tpu.memory_space<vmem>>, vector<128x128xf32>
    %c0_13 = arith.constant 0 : index
    %c0_14 = arith.constant 0 : index
    %12 = vector.load %arg4[%c0_13, %c0_14] : memref<128x128xf32, #tpu.memory_space<vmem>>, vector<128x128xf32>
    %cst_15 = arith.constant dense<0.000000e+00> : vector<128x128xf32>
    %13 = tpu.matmul %11, %12, %cst_15 {dimension_numbers = #tpu.dot_dimension_numbers<[1], [0], [0], [1], [0, 0, 1, 1], [], []>} : vector<128x128xf32>, vector<128x128xf32>, vector<128x128xf32> -> vector<128x128xf32>
    %c0_16 = arith.constant 0 : index
    %c0_17 = arith.constant 0 : index
    %14 = vector.load %arg1[%c0_16, %c0_17] : memref<128x128xf32, #tpu.memory_space<vmem>>, vector<128x128xf32>
    %cst_18 = arith.constant dense<0.000000e+00> : vector<128x128xf32>
    %15 = tpu.matmul %14, %13, %cst_18 {dimension_numbers = #tpu.dot_dimension_numbers<[1], [0], [0], [1], [0, 0, 1, 1], [], []>} : vector<128x128xf32>, vector<128x128xf32>, vector<128x128xf32> -> vector<128x128xf32>
    %c0_19 = arith.constant 0 : index
    %c0_20 = arith.constant 0 : index
    %16 = vector.load %arg5[%c0_19, %c0_20] : memref<1x128xf32, #tpu.memory_space<vmem>>, vector<1x128xf32>
    %17 = vector.broadcast %16 : vector<1x128xf32> to vector<128x128xf32>
    %18 = arith.addf %15, %17 : vector<128x128xf32>
    %cst_21 = arith.constant dense<0xFF800000> : vector<128xf32>
    %19 = vector.multi_reduction <maximumf>, %18, %cst_21 [1] : vector<128x128xf32> to vector<128xf32>
    %20 = vector.shape_cast %19 : vector<128xf32> to vector<128x1xf32>
    %21 = vector.broadcast %20 : vector<128x1xf32> to vector<128x128xf32>
    %22 = arith.subf %18, %21 : vector<128x128xf32>
    %23 = math.exp %22 : vector<128x128xf32>
    %cst_22 = arith.constant dense<0.000000e+00> : vector<128xf32>
    %24 = vector.multi_reduction <add>, %23, %cst_22 [1] : vector<128x128xf32> to vector<128xf32>
    %25 = vector.shape_cast %24 : vector<128xf32> to vector<128x1xf32>
    %26 = math.log %25 : vector<128x1xf32>
    %27 = vector.broadcast %26 : vector<128x1xf32> to vector<128x128xf32>
    %28 = arith.subf %22, %27 : vector<128x128xf32>
    %c0_23 = arith.constant 0 : index
    %c0_24 = arith.constant 0 : index
    %29 = vector.load %arg6[%c0_23, %c0_24] : memref<128x128xf32, #tpu.memory_space<vmem>>, vector<128x128xf32>
    tpu.vector_store %arg6[%c0_23, %c0_24], %28 {strides = array<i32>} : memref<128x128xf32, #tpu.memory_space<vmem>>, vector<128x128xf32>,
    return
  }
}

</mosaic_0001>

<bundles_post_ra>
// kernel: tpu_custom_call.1
= control target key start
LH: loop header
LB: loop body
LE: loop exit
PB: predicated region body
PF: predicated region fallthrough
CT: control target
= control target key end

     0   :  { %11 = vsyncpa [#allocation4], 0  ;;  %s1952_s0 = inlined_call_operand.hbm [shape: f32[128,128], index: 0, kind: input, shape index: {}]   ;;  %s1953_s1 = inlined_call_operand.hbm [shape: f32[128,128], index: 1, kind: input, shape index: {}]   ;;  %s1954_s2 = inlined_call_operand.hbm [shape: f32[128,128], index: 2, kind: input, shape index: {}]   ;;  %s1955_s3 = inlined_call_operand.vmem [shape: f32[1,128], index: 3, kind: input, shape index: {}]   ;;  %s1956_s4 = inlined_call_operand.hbm [shape: f32[128,128], index: 4, kind: input, shape index: {}]   ;;  %s1957_s5 = inlined_call_operand.vmem [shape: f32[1,128], index: 5, kind: input, shape index: {}]   ;;  %s1958_s6 = inlined_call_operand.hbm [shape: f32[128,128], index: 6, kind: output, shape index: {}]  }
   0x1   :  { %12 = vsyncpa [#allocation7], 0 }
   0x2   :  { %13 = vsyncpa [#allocation10], 0 }
   0x3   :  { %14 = vsyncpa [#allocation5], 0  ;;  %s1667_s21 = smov [#allocation6]   ;;  %s1668_s23 = smov [#allocation3]  }
   0x4   :  { %s32_s22 = sshll.u32 %s1667_s21, 4  ;;  %s20_s24 = sshll.u32 %s1668_s23, 4  ;;  %s33_s22 = int_to_ptr.vmem [resolvable:$true] %s32_s22  ;;  %s1709_s24 = int_to_ptr.vmem [resolvable:$true] %s20_s24 }
   0x5   :  { %s1549_s27 = scalar_lea.hbm %s1953_s1, 2048 }
   0x6   :  { %p1550_p0 = scmp.ne.s32.totalorder %s1953_s1, %s1549_s27  ;;  %p1553_p1 = scmp.lt.u32.totalorder %s1549_s27, %s1953_s1 }
   0x8   :  { %p1555_p2 = pnand %p1553_p1, %p1550_p0 }
   0xa   :  { %1558 = shalt.err (!%p1555_p2)
}
   0xb   :  { %s1559_s8 = scalar_lea.vmem %s33_s22, 2048  ;;  %p1564_p4 = scmp.lt.s32.totalorder %s33_s22, %s33_s22 }
   0xc   :  { %p1560_p3 = scmp.ne.s32.totalorder %s33_s22, %s1559_s8  ;;  %p1565_p5 = scmp.lt.s32.totalorder %s1559_s8, %s1559_s8 }
   0xe   :  { %p1566_p6 = por %p1565_p5, %p1564_p4 }
  0x10   :  { %p1567_p7 = pnand %p1566_p6, %p1560_p3 }
  0x12   :  { %1570 = shalt.err (!%p1567_p7)
}
  0x13   :  { %s1669_s9 = smov 128   ;;  %s1670_s10 = smov 8  }
  0x14   :  { %38 = dma.hbm_to_vmem [thread:$0]  %s1953_s1, 2048, %s33_s22, [#allocation7], %s1669_s9, %s1669_s9, %s1670_s10  }
  0x15   :  { %s1571_s15 = scalar_lea.hbm %s1952_s0, 2048 }
  0x16   :  { %p1572_p8 = scmp.ne.s32.totalorder %s1952_s0, %s1571_s15  ;;  %p1575_p9 = scmp.lt.u32.totalorder %s1571_s15, %s1952_s0 }
  0x18   :  { %p1577_p10 = pnand %p1575_p9, %p1572_p8 }
  0x1a   :  { %1580 = shalt.err (!%p1577_p10)
}
  0x1b   :  { %s1581_s20 = scalar_lea.vmem %s1709_s24, 2048  ;;  %p1586_p12 = scmp.lt.s32.totalorder %s1709_s24, %s1709_s24 }
  0x1c   :  { %p1582_p11 = scmp.ne.s32.totalorder %s1709_s24, %s1581_s20  ;;  %p1587_p13 = scmp.lt.s32.totalorder %s1581_s20, %s1581_s20 }
  0x1e   :  { %p1588_p0 = por %p1587_p13, %p1586_p12 }
  0x20   :  { %p1589_p1 = pnand %p1588_p0, %p1582_p11 }
  0x22   :  { %1592 = shalt.err (!%p1589_p1)
}
  0x23   :  { %26 = dma.hbm_to_vmem [thread:$0]  %s1952_s0, 2048, %s1709_s24, [#allocation4], %s1669_s9, %s1669_s9, %s1670_s10  }
  0x24   :  { %s1671_s22 = smov [#allocation8]   ;;  %s1672_s25 = smov [#allocation9]  }
  0x25   :  { %s44_s23 = sshll.u32 %s1671_s22, 4  ;;  %s58_s26 = sshll.u32 %s1672_s25, 4  ;;  %s45_s23 = int_to_ptr.vmem [resolvable:$true] %s44_s23  ;;  %s1746_s26 = int_to_ptr.vmem [resolvable:$true] %s58_s26 }
  0x26   :  { %s1593_s29 = scalar_lea.hbm %s1954_s2, 2048 }
  0x27   :  { %p1594_p2 = scmp.ne.s32.totalorder %s1954_s2, %s1593_s29  ;;  %p1597_p3 = scmp.lt.u32.totalorder %s1593_s29, %s1954_s2 }
  0x29   :  { %p1599_p4 = pnand %p1597_p3, %p1594_p2 }
  0x2b   :  { %1602 = shalt.err (!%p1599_p4)
}
  0x2c   :  { %s1603_s0 = scalar_lea.vmem %s45_s23, 2048  ;;  %p1608_p6 = scmp.lt.s32.totalorder %s45_s23, %s45_s23 }
  0x2d   :  { %p1604_p5 = scmp.ne.s32.totalorder %s45_s23, %s1603_s0  ;;  %p1609_p7 = scmp.lt.s32.totalorder %s1603_s0, %s1603_s0 }
  0x2f   :  { %p1610_p8 = por %p1609_p7, %p1608_p6 }
  0x31   :  { %p1611_p9 = pnand %p1610_p8, %p1604_p5 }
  0x33   :  { %1614 = shalt.err (!%p1611_p9)
}
  0x34   :  { %50 = dma.hbm_to_vmem [thread:$0]  %s1954_s2, 2048, %s45_s23, [#allocation7], %s1669_s9, %s1669_s9, %s1670_s10  }
  0x35   :  { %s1615_s15 = scalar_lea.hbm %s1956_s4, 2048 }
  0x36   :  { %p1616_p10 = scmp.ne.s32.totalorder %s1956_s4, %s1615_s15  ;;  %p1619_p11 = scmp.lt.u32.totalorder %s1615_s15, %s1956_s4 }
  0x38   :  { %p1621_p12 = pnand %p1619_p11, %p1616_p10 }
  0x3a   :  { %1624 = shalt.err (!%p1621_p12)
}
  0x3b   :  { %s1625_s20 = scalar_lea.vmem %s1746_s26, 2048  ;;  %p1630_p0 = scmp.lt.s32.totalorder %s1746_s26, %s1746_s26 }
  0x3c   :  { %p1626_p13 = scmp.ne.s32.totalorder %s1746_s26, %s1625_s20  ;;  %p1631_p1 = scmp.lt.s32.totalorder %s1625_s20, %s1625_s20 }
  0x3e   :  { %p1632_p2 = por %p1631_p1, %p1630_p0 }
  0x40   :  { %p1633_p3 = pnand %p1632_p2, %p1626_p13 }
  0x42   :  { %1636 = shalt.err (!%p1633_p3)
}
  0x43   :  { %64 = dma.hbm_to_vmem [thread:$0]  %s1956_s4, 2048, %s1746_s26, [#allocation10], %s1669_s9, %s1669_s9, %s1670_s10  }
  0x44   :  { %1659 = dma.done.wait [#allocation4], 2048  }
  0x45   :  { %1660 = vsyncadd [#allocation4], 4294965248 }
  0x46   :  { %1661 = dma.done.wait [#allocation7], 4096  }
  0x47   :  { %1662 = vsyncadd [#allocation7], 4294963200 }
  0x48   :  { %1663 = dma.done.wait [#allocation10], 2048  }
  0x49   :  { %1664 = vsyncadd [#allocation10], 4294965248  ;;  %v95_v0 = vld [vmem:[#allocation8] sm:$0xff]  ;;  %v96_v1 = vld [vmem:[#allocation8 + $0x8] sm:$0xff] }
  0x4a   :  { %v97_v2 = vld [vmem:[#allocation8 + $0x10] sm:$0xff]  ;;  %v1350_v3 = vpack.c.bf16 %v96_v1, %v95_v0  ;;  %v98_v4 = vld [vmem:[#allocation8 + $0x18] sm:$0xff]  ;;  %v99_v6 = vld [vmem:[#allocation8 + $0x20] sm:$0xff] }
  0x4b   :  { %v1354_v5 = vpack.c.bf16 %v98_v4, %v97_v2  ;;  %v100_v7 = vld [vmem:[#allocation8 + $0x28] sm:$0xff]  ;;  %v79_v9 = vld [vmem:[#allocation3] sm:$0xff]  ;;  %v101_v10 = vld [vmem:[#allocation8 + $0x30] sm:$0xff] }
  0x4c   :  { %1351 = vmatprep.subr.bf16.mxu0 %v1350_v3  ;;  %v1358_v8 = vpack.c.bf16 %v100_v7, %v99_v6  ;;  %v102_v11 = vld [vmem:[#allocation8 + $0x38] sm:$0xff]  ;;  %1158 = vmatprep.mubr.f32.mxu0 %v79_v9  ;;  %v103_v13 = vld [vmem:[#allocation8 + $0x40] sm:$0xff]  ;;  %v104_v14 = vld [vmem:[#allocation8 + $0x48] sm:$0xff] }
  0x4d   :  { %1353 = vmatpush3.bf16.msra.mxu0 %v1350_v3  ;;  %v1362_v12 = vpack.c.bf16 %v102_v11, %v101_v10  ;;  %v1366_v15 = vpack.c.bf16 %v104_v14, %v103_v13  ;;  %v105_v16 = vld [vmem:[#allocation8 + $0x50] sm:$0xff]  ;;  %v106_v17 = vld [vmem:[#allocation8 + $0x58] sm:$0xff]  ;;  %v107_v19 = vld [vmem:[#allocation8 + $0x60] sm:$0xff] }
  0x4e   :  { %1355 = vmatprep.subr.bf16.mxu0 %v1354_v5  ;;  %v1370_v18 = vpack.c.bf16 %v106_v17, %v105_v16  ;;  %v108_v20 = vld [vmem:[#allocation8 + $0x68] sm:$0xff]  ;;  %v109_v22 = vld [vmem:[#allocation8 + $0x70] sm:$0xff]  ;;  %v110_v23 = vld [vmem:[#allocation8 + $0x78] sm:$0xff] }
  0x4f   :  { %v1374_v21 = vpack.c.bf16 %v108_v20, %v107_v19  ;;  %v1378_v24 = vpack.c.bf16 %v110_v23, %v109_v22  ;;  %v80_v25 = vld [vmem:[#allocation3 + $0x8] sm:$0xff]  ;;  %v81_v26 = vld [vmem:[#allocation3 + $0x10] sm:$0xff]  ;;  %v82_v27 = vld [vmem:[#allocation3 + $0x18] sm:$0xff] }
  0x50   :  { %v83_v28 = vld [vmem:[#allocation3 + $0x20] sm:$0xff]  ;;  %v84_v29 = vld [vmem:[#allocation3 + $0x28] sm:$0xff]  ;;  %v85_v30 = vld [vmem:[#allocation3 + $0x30] sm:$0xff] }
  0x51   :  { %1357 = vmatpush3.bf16.msra.mxu0 %v1354_v5  ;;  %v86_v31 = vld [vmem:[#allocation3 + $0x38] sm:$0xff]  ;;  %v87_v32 = vld [vmem:[#allocation3 + $0x40] sm:$0xff]  ;;  %v88_v33 = vld [vmem:[#allocation3 + $0x48] sm:$0xff] }
  0x52   :  { %1359 = vmatprep.subr.bf16.mxu0 %v1358_v8  ;;  %v89_v34 = vld [vmem:[#allocation3 + $0x50] sm:$0xff]  ;;  %v90_v35 = vld [vmem:[#allocation3 + $0x58] sm:$0xff]  ;;  %v91_v36 = vld [vmem:[#allocation3 + $0x60] sm:$0xff] }
  0x53   :  { %v92_v37 = vld [vmem:[#allocation3 + $0x68] sm:$0xff]  ;;  %v93_v38 = vld [vmem:[#allocation3 + $0x70] sm:$0xff]  ;;  %v94_v39 = vld [vmem:[#allocation3 + $0x78] sm:$0xff] }
  0x54   :  { %v1783_v40 = vld [vmem:[#allocation6] sm:$0xff]  ;;  %v473_v42 = vld [vmem:[#allocation9 + $0x8] sm:$0xff]  ;;  %v474_v43 = vld [vmem:[#allocation9 + $0x10] sm:$0xff] }
  0x55   :  { %1361 = vmatpush3.bf16.msra.mxu0 %v1358_v8  ;;  %1214 = vmatprep.mubr.f32.mxu1 %v1783_v40  ;;  %v472_v41 = vld [vmem:[#allocation9] sm:$0xff]  ;;  %v475_v45 = vld [vmem:[#allocation9 + $0x18] sm:$0xff]  ;;  %v477_v48 = vld [vmem:[#allocation9 + $0x28] sm:$0xff] }
  0x56   :  { %1363 = vmatprep.subr.bf16.mxu0 %v1362_v12  ;;  %v1414_v44 = vpack.c.bf16 %v473_v42, %v472_v41  ;;  %v1418_v46 = vpack.c.bf16 %v475_v45, %v474_v43  ;;  %v476_v47 = vld [vmem:[#allocation9 + $0x20] sm:$0xff]  ;;  %v478_v50 = vld [vmem:[#allocation9 + $0x30] sm:$0xff]  ;;  %v479_v51 = vld [vmem:[#allocation9 + $0x38] sm:$0xff] }
  0x57   :  { %v1422_v49 = vpack.c.bf16 %v477_v48, %v476_v47  ;;  %v1426_v52 = vpack.c.bf16 %v479_v51, %v478_v50  ;;  %v480_v53 = vld [vmem:[#allocation9 + $0x40] sm:$0xff]  ;;  %v481_v54 = vld [vmem:[#allocation9 + $0x48] sm:$0xff]  ;;  %v482_v56 = vld [vmem:[#allocation9 + $0x50] sm:$0xff] }
  0x58   :  { %v1430_v55 = vpack.c.bf16 %v481_v54, %v480_v53  ;;  %v483_v57 = vld [vmem:[#allocation9 + $0x58] sm:$0xff]  ;;  %v484_v59 = vld [vmem:[#allocation9 + $0x60] sm:$0xff]  ;;  %v485_v60 = vld [vmem:[#allocation9 + $0x68] sm:$0xff] }
  0x59   :  { %1365 = vmatpush3.bf16.msra.mxu0 %v1362_v12  ;;  %v1434_v58 = vpack.c.bf16 %v483_v57, %v482_v56  ;;  %v1438_v61 = vpack.c.bf16 %v485_v60, %v484_v59  ;;  %v1786_v22 = vld [vmem:[#allocation6 + $0x8] sm:$0xff]  ;;  %v1788_v23 = vld [vmem:[#allocation6 + $0x10] sm:$0xff]  ;;  %v996_v41 = vld [vmem:[%s1955_s3] ss:$0 sm:$0xff] }
  0x5a   :  { %1367 = vmatprep.subr.bf16.mxu0 %v1366_v15 }
  0x5d   :  { %1369 = vmatpush3.bf16.msra.mxu0 %v1366_v15 }
  0x5e   :  { %1371 = vmatprep.subr.bf16.mxu0 %v1370_v18 }
  0x61   :  { %1373 = vmatpush3.bf16.msra.mxu0 %v1370_v18 }
  0x62   :  { %1375 = vmatprep.subr.bf16.mxu0 %v1374_v21 }
  0x65   :  { %1377 = vmatpush3.bf16.msra.mxu0 %v1374_v21 }
  0x66   :  { %1379 = vmatprep.subr.bf16.mxu0 %v1378_v24 }
  0x69   :  { %1381 = vmatpush3.bf16.msra.mxu0 %v1378_v24  ;;  %v1792_v24 = vld [vmem:[#allocation6 + $0x18] sm:$0xff] }
  0x6a   :  { %1415 = vmatprep.subr.bf16.mxu0 %v1414_v44 }
  0x6c   :  { %1159 = vmatmul.mubr.f32.vlgmr.msra.gmra.mrb[0].mxu0 %v80_v25  ;;  %v1794_v25 = vld [vmem:[#allocation6 + $0x20] sm:$0xff] }
  0x6d   :  { %1161 = vmatprep.mubr.f32.mxu0 %v81_v26  ;;  %1417 = vmatpush3.bf16.msra.mxu0 %v1414_v44  ;;  %v1798_v26 = vld [vmem:[#allocation6 + $0x28] sm:$0xff] }
  0x6e   :  { %1419 = vmatprep.subr.bf16.mxu0 %v1418_v46 }
  0x70   :  { %1162 = vmatmul.mubr.f32.gmra.mrb[2].mxu0 %v82_v27  ;;  %v1800_v27 = vld [vmem:[#allocation6 + $0x30] sm:$0xff] }
  0x71   :  { %1164 = vmatprep.mubr.f32.mxu0 %v83_v28  ;;  %1421 = vmatpush3.bf16.msra.mxu0 %v1418_v46  ;;  %v1804_v28 = vld [vmem:[#allocation6 + $0x38] sm:$0xff] }
  0x72   :  { %1423 = vmatprep.subr.bf16.mxu0 %v1422_v49 }
  0x74   :  { %1165 = vmatmul.mubr.f32.gmra.mrb[4].mxu0 %v84_v29  ;;  %v1806_v29 = vld [vmem:[#allocation6 + $0x40] sm:$0xff] }
  0x75   :  { %1167 = vmatprep.mubr.f32.mxu0 %v85_v30  ;;  %1425 = vmatpush3.bf16.msra.mxu0 %v1422_v49  ;;  %v1810_v30 = vld [vmem:[#allocation6 + $0x48] sm:$0xff] }
  0x76   :  { %1427 = vmatprep.subr.bf16.mxu0 %v1426_v52 }
  0x78   :  { %1168 = vmatmul.mubr.f32.gmra.mrb[6].mxu0 %v86_v31  ;;  %v1812_v31 = vld [vmem:[#allocation6 + $0x50] sm:$0xff] }
  0x79   :  { %1170 = vmatprep.mubr.f32.mxu0 %v87_v32  ;;  %1429 = vmatpush3.bf16.msra.mxu0 %v1426_v52  ;;  %v1816_v32 = vld [vmem:[#allocation6 + $0x58] sm:$0xff] }
  0x7a   :  { %1431 = vmatprep.subr.bf16.mxu0 %v1430_v55 }
  0x7c   :  { %1171 = vmatmul.mubr.f32.gmra.mrb[8].mxu0 %v88_v33  ;;  %v1818_v33 = vld [vmem:[#allocation6 + $0x60] sm:$0xff] }
  0x7d   :  { %1173 = vmatprep.mubr.f32.mxu0 %v89_v34  ;;  %1433 = vmatpush3.bf16.msra.mxu0 %v1430_v55  ;;  %v1822_v34 = vld [vmem:[#allocation6 + $0x68] sm:$0xff] }
  0x7e   :  { %1435 = vmatprep.subr.bf16.mxu0 %v1434_v58 }
  0x80   :  { %1174 = vmatmul.mubr.f32.gmra.mrb[10].mxu0 %v90_v35  ;;  %v1824_v35 = vld [vmem:[#allocation6 + $0x70] sm:$0xff] }
  0x81   :  { %1176 = vmatprep.mubr.f32.mxu0 %v91_v36  ;;  %1437 = vmatpush3.bf16.msra.mxu0 %v1434_v58  ;;  %v1828_v36 = vld [vmem:[#allocation6 + $0x78] sm:$0xff] }
  0x82   :  { %1439 = vmatprep.subr.bf16.mxu0 %v1438_v61 }
  0x84   :  { %1177 = vmatmul.mubr.f32.gmra.mrb[12].mxu0 %v92_v37  ;;  %v486_v37 = vld [vmem:[#allocation9 + $0x70] sm:$0xff] }
  0x85   :  { %1179 = vmatprep.mubr.f32.mxu0 %v93_v38  ;;  %1441 = vmatpush3.bf16.msra.mxu0 %v1438_v61  ;;  %v487_v38 = vld [vmem:[#allocation9 + $0x78] sm:$0xff] }
  0x88   :  { %1180 = vmatmul.mubr.f32.gmra.mrb[14].mxu0 %v94_v39  ;;  %v1442_v39 = vpack.c.bf16 %v487_v38, %v486_v37 }
  0x8a   :  { %1443 = vmatprep.subr.bf16.mxu0 %v1442_v39 }
  0x8b   :  { %1445 = vmatpush3.bf16.msra.mxu0 %v1442_v39 }
 0x13f   :  { %v1160_v62 = vpop.f32.mrb[0].mxu0 }
 0x140   :  { %v177_v63 = vpop.f32.mrb[1].mxu0 }
 0x141   :  { %v1382_v0 = vpack.c.bf16 %v1160_v62, %v177_v63 }
 0x143   :  { %v1163_v1 = vpop.f32.mrb[2].mxu0  ;;  %1383 = vmatprep.subr.bf16.mxu1 %v1382_v0 }
 0x144   :  { %v187_v2 = vpop.f32.mrb[3].mxu0  ;;  %1385 = vmatpush3.bf16.msra.mxu1 %v1382_v0 }
 0x145   :  { %v1386_v3 = vpack.c.bf16 %v1163_v1, %v187_v2 }
 0x147   :  { %v1166_v4 = vpop.f32.mrb[4].mxu0  ;;  %1387 = vmatprep.subr.bf16.mxu1 %v1386_v3 }
 0x148   :  { %v197_v5 = vpop.f32.mrb[5].mxu0  ;;  %1389 = vmatpush3.bf16.msra.mxu1 %v1386_v3 }
 0x149   :  { %v1390_v6 = vpack.c.bf16 %v1166_v4, %v197_v5 }
 0x14b   :  { %v1169_v7 = vpop.f32.mrb[6].mxu0  ;;  %1391 = vmatprep.subr.bf16.mxu1 %v1390_v6 }
 0x14c   :  { %v207_v8 = vpop.f32.mrb[7].mxu0  ;;  %1393 = vmatpush3.bf16.msra.mxu1 %v1390_v6 }
 0x14d   :  { %v1394_v9 = vpack.c.bf16 %v1169_v7, %v207_v8 }
 0x14f   :  { %v1172_v10 = vpop.f32.mrb[8].mxu0  ;;  %1395 = vmatprep.subr.bf16.mxu1 %v1394_v9 }
 0x150   :  { %v217_v11 = vpop.f32.mrb[9].mxu0  ;;  %1397 = vmatpush3.bf16.msra.mxu1 %v1394_v9 }
 0x151   :  { %v1398_v12 = vpack.c.bf16 %v1172_v10, %v217_v11 }
 0x153   :  { %v1175_v13 = vpop.f32.mrb[10].mxu0  ;;  %1399 = vmatprep.subr.bf16.mxu1 %v1398_v12 }
 0x154   :  { %v227_v14 = vpop.f32.mrb[11].mxu0  ;;  %1401 = vmatpush3.bf16.msra.mxu1 %v1398_v12 }
 0x155   :  { %v1402_v15 = vpack.c.bf16 %v1175_v13, %v227_v14 }
 0x157   :  { %v1178_v16 = vpop.f32.mrb[12].mxu0  ;;  %1403 = vmatprep.subr.bf16.mxu1 %v1402_v15 }
 0x158   :  { %v237_v17 = vpop.f32.mrb[13].mxu0  ;;  %1405 = vmatpush3.bf16.msra.mxu1 %v1402_v15 }
 0x159   :  { %v1406_v18 = vpack.c.bf16 %v1178_v16, %v237_v17 }
 0x15b   :  { %v1181_v19 = vpop.f32.mrb[14].mxu0  ;;  %1407 = vmatprep.subr.bf16.mxu1 %v1406_v18 }
 0x15c   :  { %v247_v20 = vpop.f32.mrb[15].mxu0  ;;  %1409 = vmatpush3.bf16.msra.mxu1 %v1406_v18 }
 0x15d   :  { %v1410_v21 = vpack.c.bf16 %v1181_v19, %v247_v20 }
 0x15f   :  { %1411 = vmatprep.subr.bf16.mxu1 %v1410_v21 }
 0x160   :  { %1413 = vmatpush3.bf16.msra.mxu1 %v1410_v21 }
 0x163   :  { %1215 = vmatmul.mubr.f32.vlgmr.msra.gmra.mrb[0].mxu1 %v1786_v22 }
 0x164   :  { %1217 = vmatprep.mubr.f32.mxu1 %v1788_v23 }
 0x167   :  { %1218 = vmatmul.mubr.f32.gmra.mrb[2].mxu1 %v1792_v24 }
 0x168   :  { %1220 = vmatprep.mubr.f32.mxu1 %v1794_v25 }
 0x16b   :  { %1221 = vmatmul.mubr.f32.gmra.mrb[4].mxu1 %v1798_v26 }
 0x16c   :  { %1223 = vmatprep.mubr.f32.mxu1 %v1800_v27 }
 0x16f   :  { %1224 = vmatmul.mubr.f32.gmra.mrb[6].mxu1 %v1804_v28 }
 0x170   :  { %1226 = vmatprep.mubr.f32.mxu1 %v1806_v29 }
 0x173   :  { %1227 = vmatmul.mubr.f32.gmra.mrb[8].mxu1 %v1810_v30 }
 0x174   :  { %1229 = vmatprep.mubr.f32.mxu1 %v1812_v31 }
 0x177   :  { %1230 = vmatmul.mubr.f32.gmra.mrb[10].mxu1 %v1816_v32 }
 0x178   :  { %1232 = vmatprep.mubr.f32.mxu1 %v1818_v33 }
 0x17b   :  { %1233 = vmatmul.mubr.f32.gmra.mrb[12].mxu1 %v1822_v34 }
 0x17c   :  { %1235 = vmatprep.mubr.f32.mxu1 %v1824_v35 }
 0x17f   :  { %1236 = vmatmul.mubr.f32.gmra.mrb[14].mxu1 %v1828_v36 }
 0x180   :  { %1326 = vmatprep.mubr.f32.mxu1 %v1783_v40 }
 0x236   :  { %v1216_v42 = vpop.f32.mrb[0].mxu1 }
 0x237   :  { %v351_v43 = vadd.f32 %v1216_v42, %v996_v41  ;;  %v345_v44 = vpop.f32.mrb[1].mxu1 }
 0x238   :  { %v346_v45 = vadd.f32 %v996_v41, %v345_v44 }
 0x239   :  { %v425_v48 = vmax.f32 %v351_v43, 0.0 }
 0x23a   :  { %v424_v46 = vmax.f32 %v346_v45, 0.0  ;;  %v1219_v47 = vpop.f32.mrb[2].mxu1 }
 0x23b   :  { %v361_v49 = vadd.f32 %v1219_v47, %v996_v41  ;;  %v355_v50 = vpop.f32.mrb[3].mxu1 }
 0x23c   :  { %v356_v51 = vadd.f32 %v996_v41, %v355_v50  ;;  %1270 = vmatprep.mubr.f32.mxu0 %v424_v46 }
 0x23d   :  { %1271 = vmatmul.mubr.f32.vlgmr.msra.gmra.mrb[16].mxu0 %v425_v48  ;;  %v427_v53 = vmax.f32 %v361_v49, 0.0 }
 0x23e   :  { %v426_v40 = vmax.f32 %v356_v51, 0.0  ;;  %v1222_v52 = vpop.f32.mrb[4].mxu1 }
 0x23f   :  { %v371_v54 = vadd.f32 %v1222_v52, %v996_v41  ;;  %v365_v55 = vpop.f32.mrb[5].mxu1 }
 0x240   :  { %v366_v56 = vadd.f32 %v996_v41, %v365_v55  ;;  %1273 = vmatprep.mubr.f32.mxu0 %v426_v40 }
 0x241   :  { %1274 = vmatmul.mubr.f32.gmra.mrb[18].mxu0 %v427_v53  ;;  %v429_v59 = vmax.f32 %v371_v54, 0.0 }
 0x242   :  { %v428_v57 = vmax.f32 %v366_v56, 0.0  ;;  %v1225_v58 = vpop.f32.mrb[6].mxu1 }
 0x243   :  { %v381_v60 = vadd.f32 %v1225_v58, %v996_v41  ;;  %v375_v61 = vpop.f32.mrb[7].mxu1 }
 0x244   :  { %v376_v62 = vadd.f32 %v996_v41, %v375_v61  ;;  %1276 = vmatprep.mubr.f32.mxu0 %v428_v57 }
 0x245   :  { %1277 = vmatmul.mubr.f32.gmra.mrb[20].mxu0 %v429_v59  ;;  %v431_v1 = vmax.f32 %v381_v60, 0.0 }
 0x246   :  { %v430_v63 = vmax.f32 %v376_v62, 0.0  ;;  %v1228_v0 = vpop.f32.mrb[8].mxu1 }
 0x247   :  { %v391_v2 = vadd.f32 %v1228_v0, %v996_v41  ;;  %v385_v3 = vpop.f32.mrb[9].mxu1 }
 0x248   :  { %v386_v4 = vadd.f32 %v996_v41, %v385_v3  ;;  %1279 = vmatprep.mubr.f32.mxu0 %v430_v63 }
 0x249   :  { %1280 = vmatmul.mubr.f32.gmra.mrb[22].mxu0 %v431_v1  ;;  %v433_v7 = vmax.f32 %v391_v2, 0.0 }
 0x24a   :  { %v432_v5 = vmax.f32 %v386_v4, 0.0  ;;  %v1231_v6 = vpop.f32.mrb[10].mxu1 }
 0x24b   :  { %v401_v8 = vadd.f32 %v1231_v6, %v996_v41  ;;  %v395_v9 = vpop.f32.mrb[11].mxu1 }
 0x24c   :  { %v396_v10 = vadd.f32 %v996_v41, %v395_v9  ;;  %1282 = vmatprep.mubr.f32.mxu0 %v432_v5 }
 0x24d   :  { %1283 = vmatmul.mubr.f32.gmra.mrb[24].mxu0 %v433_v7  ;;  %v435_v13 = vmax.f32 %v401_v8, 0.0 }
 0x24e   :  { %v434_v11 = vmax.f32 %v396_v10, 0.0  ;;  %v1234_v12 = vpop.f32.mrb[12].mxu1 }
 0x24f   :  { %v411_v14 = vadd.f32 %v1234_v12, %v996_v41  ;;  %v405_v15 = vpop.f32.mrb[13].mxu1 }
 0x250   :  { %v406_v16 = vadd.f32 %v996_v41, %v405_v15  ;;  %1285 = vmatprep.mubr.f32.mxu0 %v434_v11 }
 0x251   :  { %1286 = vmatmul.mubr.f32.gmra.mrb[26].mxu0 %v435_v13  ;;  %v437_v19 = vmax.f32 %v411_v14, 0.0 }
 0x252   :  { %v436_v17 = vmax.f32 %v406_v16, 0.0  ;;  %v1237_v18 = vpop.f32.mrb[14].mxu1 }
 0x253   :  { %v421_v20 = vadd.f32 %v1237_v18, %v996_v41  ;;  %v415_v21 = vpop.f32.mrb[15].mxu1 }
 0x254   :  { %v416_v37 = vadd.f32 %v996_v41, %v415_v21  ;;  %1288 = vmatprep.mubr.f32.mxu0 %v436_v17 }
 0x255   :  { %1289 = vmatmul.mubr.f32.gmra.mrb[28].mxu0 %v437_v19  ;;  %v439_v39 = vmax.f32 %v421_v20, 0.0 }
 0x256   :  { %v438_v38 = vmax.f32 %v416_v37, 0.0 }
 0x258   :  { %1291 = vmatprep.mubr.f32.mxu0 %v438_v38 }
 0x259   :  { %1292 = vmatmul.mubr.f32.gmra.mrb[30].mxu0 %v439_v39 }
 0x310   :  { %v1272_v42 = vpop.f32.mrb[16].mxu0 }
 0x311   :  { %v554_v43 = vpop.f32.mrb[17].mxu0 }
 0x312   :  { %v1446_v44 = vpack.c.bf16 %v1272_v42, %v554_v43 }
 0x314   :  { %v1275_v45 = vpop.f32.mrb[18].mxu0  ;;  %1447 = vmatprep.subr.bf16.mxu1 %v1446_v44 }
 0x315   :  { %v564_v46 = vpop.f32.mrb[19].mxu0  ;;  %1449 = vmatpush3.bf16.msra.mxu1 %v1446_v44 }
 0x316   :  { %v1450_v47 = vpack.c.bf16 %v1275_v45, %v564_v46 }
 0x318   :  { %v1278_v48 = vpop.f32.mrb[20].mxu0  ;;  %1451 = vmatprep.subr.bf16.mxu1 %v1450_v47 }
 0x319   :  { %v574_v49 = vpop.f32.mrb[21].mxu0  ;;  %1453 = vmatpush3.bf16.msra.mxu1 %v1450_v47 }
 0x31a   :  { %v1454_v50 = vpack.c.bf16 %v1278_v48, %v574_v49 }
 0x31c   :  { %v1281_v41 = vpop.f32.mrb[22].mxu0  ;;  %1455 = vmatprep.subr.bf16.mxu1 %v1454_v50 }
 0x31d   :  { %v584_v51 = vpop.f32.mrb[23].mxu0  ;;  %1457 = vmatpush3.bf16.msra.mxu1 %v1454_v50 }
 0x31e   :  { %v1458_v40 = vpack.c.bf16 %v1281_v41, %v584_v51 }
 0x320   :  { %v1284_v52 = vpop.f32.mrb[24].mxu0  ;;  %1459 = vmatprep.subr.bf16.mxu1 %v1458_v40 }
 0x321   :  { %v594_v53 = vpop.f32.mrb[25].mxu0  ;;  %1461 = vmatpush3.bf16.msra.mxu1 %v1458_v40 }
 0x322   :  { %v1462_v54 = vpack.c.bf16 %v1284_v52, %v594_v53 }
 0x324   :  { %v1287_v55 = vpop.f32.mrb[26].mxu0  ;;  %1463 = vmatprep.subr.bf16.mxu1 %v1462_v54 }
 0x325   :  { %v604_v56 = vpop.f32.mrb[27].mxu0  ;;  %1465 = vmatpush3.bf16.msra.mxu1 %v1462_v54 }
 0x326   :  { %v1466_v57 = vpack.c.bf16 %v1287_v55, %v604_v56 }
 0x328   :  { %v1290_v58 = vpop.f32.mrb[28].mxu0  ;;  %1467 = vmatprep.subr.bf16.mxu1 %v1466_v57 }
 0x329   :  { %v614_v59 = vpop.f32.mrb[29].mxu0  ;;  %1469 = vmatpush3.bf16.msra.mxu1 %v1466_v57 }
 0x32a   :  { %v1470_v60 = vpack.c.bf16 %v1290_v58, %v614_v59 }
 0x32c   :  { %v1293_v61 = vpop.f32.mrb[30].mxu0  ;;  %1471 = vmatprep.subr.bf16.mxu1 %v1470_v60 }
 0x32d   :  { %v624_v62 = vpop.f32.mrb[31].mxu0  ;;  %1473 = vmatpush3.bf16.msra.mxu1 %v1470_v60 }
 0x32e   :  { %v1474_v63 = vpack.c.bf16 %v1293_v61, %v624_v62 }
 0x330   :  { %1475 = vmatprep.subr.bf16.mxu1 %v1474_v63 }
 0x331   :  { %1477 = vmatpush3.bf16.msra.mxu1 %v1474_v63 }
 0x334   :  { %1327 = vmatmul.mubr.f32.vlgmr.msra.gmra.mrb[16].mxu1 %v1786_v22  ;;  %v997_v22 = vld [vmem:[%s1957_s5] ss:$0 sm:$0xff]  ;;  %s1673_s5 = smov [#allocation11]  }
 0x335   :  { %1329 = vmatprep.mubr.f32.mxu1 %v1788_v23  ;;  %s982_s23 = sshll.u32 %s1673_s5, 4  ;;  %s983_s23 = int_to_ptr.vmem [resolvable:$true] %s982_s23 }
 0x336   :  { %s1637_s25 = scalar_lea.vmem %s983_s23, 2048  ;;  %p1642_p5 = scmp.lt.s32.totalorder %s983_s23, %s983_s23 }
 0x337   :  { %p1638_p4 = scmp.ne.s32.totalorder %s983_s23, %s1637_s25  ;;  %p1643_p6 = scmp.lt.s32.totalorder %s1637_s25, %s1637_s25 }
 0x338   :  { %1330 = vmatmul.mubr.f32.gmra.mrb[18].mxu1 %v1792_v24 }
 0x339   :  { %1332 = vmatprep.mubr.f32.mxu1 %v1794_v25  ;;  %p1644_p7 = por %p1643_p6, %p1642_p5 }
 0x33b   :  { %p1645_p8 = pnand %p1644_p7, %p1638_p4 }
 0x33c   :  { %1333 = vmatmul.mubr.f32.gmra.mrb[20].mxu1 %v1798_v26 }
 0x33d   :  { %1335 = vmatprep.mubr.f32.mxu1 %v1800_v27 }
 0x340   :  { %1336 = vmatmul.mubr.f32.gmra.mrb[22].mxu1 %v1804_v28 }
 0x341   :  { %1338 = vmatprep.mubr.f32.mxu1 %v1806_v29 }
 0x344   :  { %1339 = vmatmul.mubr.f32.gmra.mrb[24].mxu1 %v1810_v30 }
 0x345   :  { %1341 = vmatprep.mubr.f32.mxu1 %v1812_v31 }
 0x348   :  { %1342 = vmatmul.mubr.f32.gmra.mrb[26].mxu1 %v1816_v32 }
 0x349   :  { %1344 = vmatprep.mubr.f32.mxu1 %v1818_v33 }
 0x34c   :  { %1345 = vmatmul.mubr.f32.gmra.mrb[28].mxu1 %v1822_v34 }
 0x34d   :  { %1347 = vmatprep.mubr.f32.mxu1 %v1824_v35 }
 0x350   :  { %1348 = vmatmul.mubr.f32.gmra.mrb[30].mxu1 %v1828_v36 }
 0x407   :  { %v1328_v23 = vpop.f32.mrb[16].mxu1 }
 0x408   :  { %v728_v24 = vadd.f32 %v1328_v23, %v997_v22  ;;  %v722_v25 = vpop.f32.mrb[17].mxu1 }
 0x409   :  { %v723_v27 = vadd.f32 %v997_v22, %v722_v25 }
 0x40a   :  { %803 = vmax.xlane.f32.xlu0 %v728_v24 }
 0x40b   :  { %v1331_v26 = vpop.f32.mrb[18].mxu1 }
 0x40c   :  { %v738_v28 = vadd.f32 %v1331_v26, %v997_v22  ;;  %v732_v29 = vpop.f32.mrb[19].mxu1 }
 0x40d   :  { %v733_v31 = vadd.f32 %v997_v22, %v732_v29 }
 0x40e   :  { %807 = vmax.xlane.f32.xlu1 %v738_v28  ;;  %801 = vmax.xlane.f32.xlu0 %v723_v27 }
 0x40f   :  { %v1334_v30 = vpop.f32.mrb[20].mxu1 }
 0x410   :  { %v742_v32 = vpop.f32.mrb[21].mxu1  ;;  %v748_v34 = vadd.f32 %v1334_v30, %v997_v22 }
 0x411   :  { %v743_v33 = vadd.f32 %v997_v22, %v742_v32 }
 0x412   :  { %805 = vmax.xlane.f32.xlu1 %v733_v31 }
 0x413   :  { %v1337_v35 = vpop.f32.mrb[22].mxu1  ;;  %809 = vmax.xlane.f32.xlu0 %v743_v33 }
 0x414   :  { %v752_v36 = vpop.f32.mrb[23].mxu1  ;;  %v758_v1 = vadd.f32 %v1337_v35, %v997_v22 }
 0x415   :  { %v753_v0 = vadd.f32 %v997_v22, %v752_v36 }
 0x416   :  { %811 = vmax.xlane.f32.xlu1 %v748_v34 }
 0x417   :  { %v1340_v2 = vpop.f32.mrb[24].mxu1  ;;  %813 = vmax.xlane.f32.xlu0 %v753_v0 }
 0x418   :  { %v762_v3 = vpop.f32.mrb[25].mxu1  ;;  %v768_v5 = vadd.f32 %v1340_v2, %v997_v22 }
 0x419   :  { %v763_v4 = vadd.f32 %v997_v22, %v762_v3 }
 0x41a   :  { %815 = vmax.xlane.f32.xlu1 %v758_v1 }
 0x41b   :  { %v1343_v6 = vpop.f32.mrb[26].mxu1  ;;  %817 = vmax.xlane.f32.xlu0 %v763_v4 }
 0x41c   :  { %v772_v7 = vpop.f32.mrb[27].mxu1  ;;  %v1853_v9 = vadd.f32 %v1343_v6, %v997_v22 }
 0x41d   :  { %v773_v8 = vadd.f32 %v997_v22, %v772_v7 }
 0x41e   :  { %819 = vmax.xlane.f32.xlu1 %v768_v5 }
 0x41f   :  { %v1346_v10 = vpop.f32.mrb[28].mxu1  ;;  %821 = vmax.xlane.f32.xlu0 %v773_v8 }
 0x420   :  { %v782_v11 = vpop.f32.mrb[29].mxu1  ;;  %v1857_v13 = vadd.f32 %v1346_v10, %v997_v22 }
 0x421   :  { %v1855_v12 = vadd.f32 %v997_v22, %v782_v11 }
 0x422   :  { %823 = vmax.xlane.f32.xlu1 %v1853_v9 }
 0x423   :  { %v1349_v14 = vpop.f32.mrb[30].mxu1  ;;  %825 = vmax.xlane.f32.xlu0 %v1855_v12 }
 0x424   :  { %v792_v15 = vpop.f32.mrb[31].mxu1  ;;  %v1863_v17 = vadd.f32 %v1349_v14, %v997_v22 }
 0x425   :  { %v1861_v16 = vadd.f32 %v997_v22, %v792_v15 }
 0x426   :  { %827 = vmax.xlane.f32.xlu1 %v1857_v13 }
 0x427   :  { %829 = vmax.xlane.f32.xlu0 %v1861_v16 }
 0x42a   :  { %831 = vmax.xlane.f32.xlu1 %v1863_v17 }
 0x497   :  { %v804_v18 = vpop.xlane.xlu0 %803 }
 0x498   :  { %v1868_v19 = vsub.f32 %v728_v24, %v804_v18 }
 0x49a   :  { %v851_v20 = vmul.f32 1.442695, %v1868_v19 }
 0x49b   :  { %v808_v21 = vpop.xlane.xlu1 %807  ;;  %v802_v37 = vpop.xlane.xlu0 %801 }
 0x49c   :  { %1485 = vpow2.f32 %v851_v20  ;;  %v1871_v38 = vsub.f32 %v738_v28, %v808_v21  ;;  %v1873_v39 = vsub.f32 %v723_v27, %v802_v37 }
 0x49e   :  { %v855_v42 = vmul.f32 1.442695, %v1871_v38  ;;  %v849_v43 = vmul.f32 1.442695, %v1873_v39 }
 0x49f   :  { %v806_v44 = vpop.xlane.xlu1 %805 }
 0x4a0   :  { %1487 = vpow2.f32 %v855_v42  ;;  %v1877_v45 = vsub.f32 %v733_v31, %v806_v44  ;;  %v810_v46 = vpop.xlane.xlu0 %809 }
 0x4a1   :  { %1489 = vpow2.f32 %v849_v43  ;;  %v1879_v47 = vsub.f32 %v743_v33, %v810_v46 }
 0x4a2   :  { %v853_v48 = vmul.f32 1.442695, %v1877_v45 }
 0x4a3   :  { %v812_v49 = vpop.xlane.xlu1 %811  ;;  %v857_v51 = vmul.f32 1.442695, %v1879_v47 }
 0x4a4   :  { %1491 = vpow2.f32 %v853_v48  ;;  %v1882_v50 = vsub.f32 %v748_v34, %v812_v49  ;;  %v814_v41 = vpop.xlane.xlu0 %813 }
 0x4a5   :  { %v1885_v40 = vsub.f32 %v753_v0, %v814_v41 }
 0x4a6   :  { %v1486_v52 = vpop.eup %1485  ;;  %v859_v53 = vmul.f32 1.442695, %v1882_v50 }
 0x4a7   :  { %883 = vadd.xlane.f32.xlu1 %v1486_v52  ;;  %v816_v54 = vpop.xlane.xlu1 %815  ;;  %v861_v57 = vmul.f32 1.442695, %v1885_v40 }
 0x4a8   :  { %1493 = vpow2.f32 %v859_v53  ;;  %v1888_v55 = vsub.f32 %v758_v1, %v816_v54  ;;  %v818_v56 = vpop.xlane.xlu0 %817 }
 0x4a9   :  { %1495 = vpow2.f32 %v857_v51  ;;  %v1891_v58 = vsub.f32 %v763_v4, %v818_v56 }
 0x4aa   :  { %v1488_v59 = vpop.eup %1487  ;;  %v863_v60 = vmul.f32 1.442695, %v1888_v55 }
 0x4ab   :  { %v1490_v61 = vpop.eup %1489  ;;  %887 = vadd.xlane.f32.xlu1 %v1488_v59  ;;  %v820_v62 = vpop.xlane.xlu1 %819  ;;  %v865_v23 = vmul.f32 1.442695, %v1891_v58 }
 0x4ac   :  { %1497 = vpow2.f32 %v863_v60  ;;  %v1894_v63 = vsub.f32 %v768_v5, %v820_v62  ;;  %881 = vadd.xlane.f32.xlu0 %v1490_v61  ;;  %v822_v22 = vpop.xlane.xlu0 %821 }
 0x4ad   :  { %1499 = vpow2.f32 %v861_v57  ;;  %v1897_v24 = vsub.f32 %v773_v8, %v822_v22 }
 0x4ae   :  { %v1492_v25 = vpop.eup %1491  ;;  %v867_v26 = vmul.f32 1.442695, %v1894_v63 }
 0x4af   :  { %v824_v27 = vpop.xlane.xlu1 %823  ;;  %v869_v30 = vmul.f32 1.442695, %v1897_v24 }
 0x4b0   :  { %1501 = vpow2.f32 %v867_v26  ;;  %v1901_v28 = vsub.f32 %v1853_v9, %v824_v27  ;;  %885 = vadd.xlane.f32.xlu0 %v1492_v25  ;;  %v826_v29 = vpop.xlane.xlu0 %825 }
 0x4b1   :  { %1503 = vpow2.f32 %v865_v23  ;;  %v1905_v31 = vsub.f32 %v1855_v12, %v826_v29 }
 0x4b2   :  { %v1494_v32 = vpop.eup %1493  ;;  %v871_v33 = vmul.f32 1.442695, %v1901_v28 }
 0x4b3   :  { %v1496_v34 = vpop.eup %1495  ;;  %891 = vadd.xlane.f32.xlu1 %v1494_v32  ;;  %v828_v35 = vpop.xlane.xlu1 %827  ;;  %v873_v1 = vmul.f32 1.442695, %v1905_v31 }
 0x4b4   :  { %1505 = vpow2.f32 %v871_v33  ;;  %v1909_v36 = vsub.f32 %v1857_v13, %v828_v35  ;;  %889 = vadd.xlane.f32.xlu0 %v1496_v34  ;;  %v830_v0 = vpop.xlane.xlu0 %829 }
 0x4b5   :  { %1507 = vpow2.f32 %v869_v30  ;;  %v1913_v2 = vsub.f32 %v1861_v16, %v830_v0 }
 0x4b6   :  { %v1498_v3 = vpop.eup %1497  ;;  %v875_v4 = vmul.f32 1.442695, %v1909_v36 }
 0x4b7   :  { %v1500_v5 = vpop.eup %1499  ;;  %895 = vadd.xlane.f32.xlu1 %v1498_v3  ;;  %v832_v6 = vpop.xlane.xlu1 %831  ;;  %v877_v8 = vmul.f32 1.442695, %v1913_v2 }
 0x4b8   :  { %1509 = vpow2.f32 %v875_v4  ;;  %v1917_v7 = vsub.f32 %v1863_v17, %v832_v6  ;;  %893 = vadd.xlane.f32.xlu0 %v1500_v5 }
 0x4b9   :  { %1511 = vpow2.f32 %v873_v1 }
 0x4ba   :  { %v1502_v9 = vpop.eup %1501  ;;  %v879_v10 = vmul.f32 1.442695, %v1917_v7 }
 0x4bb   :  { %v1504_v11 = vpop.eup %1503  ;;  %899 = vadd.xlane.f32.xlu1 %v1502_v9 }
 0x4bc   :  { %1513 = vpow2.f32 %v879_v10  ;;  %897 = vadd.xlane.f32.xlu0 %v1504_v11 }
 0x4bd   :  { %1515 = vpow2.f32 %v877_v8 }
 0x4be   :  { %v1506_v12 = vpop.eup %1505 }
 0x4bf   :  { %v1508_v13 = vpop.eup %1507  ;;  %903 = vadd.xlane.f32.xlu1 %v1506_v12 }
 0x4c0   :  { %901 = vadd.xlane.f32.xlu0 %v1508_v13 }
 0x4c2   :  { %v1510_v14 = vpop.eup %1509 }
 0x4c3   :  { %v1512_v15 = vpop.eup %1511  ;;  %907 = vadd.xlane.f32.xlu1 %v1510_v14 }
 0x4c4   :  { %905 = vadd.xlane.f32.xlu0 %v1512_v15 }
 0x4c6   :  { %v1514_v16 = vpop.eup %1513 }
 0x4c7   :  { %v1516_v17 = vpop.eup %1515  ;;  %911 = vadd.xlane.f32.xlu1 %v1514_v16 }
 0x4c8   :  { %909 = vadd.xlane.f32.xlu0 %v1516_v17 }
 0x534   :  { %v884_v18 = vpop.xlane.xlu1 %883 }
 0x535   :  { %1517 = vlog2.f32 %v884_v18 }
 0x538   :  { %v888_v20 = vpop.xlane.xlu1 %887 }
 0x539   :  { %1519 = vlog2.f32 %v888_v20  ;;  %v882_v21 = vpop.xlane.xlu0 %881 }
 0x53a   :  { %1521 = vlog2.f32 %v882_v21 }
 0x53d   :  { %v886_v37 = vpop.xlane.xlu0 %885 }
 0x53e   :  { %1523 = vlog2.f32 %v886_v37 }
 0x53f   :  { %v1518_v42 = vpop.eup %1517 }
 0x540   :  { %v916_v43 = vmul.f32 0.6931472, %v1518_v42  ;;  %v892_v44 = vpop.xlane.xlu1 %891 }
 0x541   :  { %1525 = vlog2.f32 %v892_v44  ;;  %v890_v46 = vpop.xlane.xlu0 %889 }
 0x542   :  { %v946_v48 = vsub.f32 %v1868_v19, %v916_v43  ;;  %1527 = vlog2.f32 %v890_v46 }
 0x543   :  { %v1520_v49 = vpop.eup %1519 }
 0x544   :  { %v1522_v41 = vpop.eup %1521  ;;  %962 = vst [vmem:[#allocation11 + $0x8] sm:$0xff] %v946_v48  ;;  %v920_v51 = vmul.f32 0.6931472, %v1520_v49  ;;  %v896_v52 = vpop.xlane.xlu1 %895 }
 0x545   :  { %v914_v53 = vmul.f32 0.6931472, %v1522_v41  ;;  %1529 = vlog2.f32 %v896_v52  ;;  %v894_v54 = vpop.xlane.xlu0 %893 }
 0x546   :  { %v948_v56 = vsub.f32 %v1871_v38, %v920_v51  ;;  %1531 = vlog2.f32 %v894_v54 }
 0x547   :  { %v945_v57 = vsub.f32 %v1873_v39, %v914_v53 }
 0x548   :  { %v1524_v59 = vpop.eup %1523  ;;  %964 = vst [vmem:[#allocation11 + $0x18] sm:$0xff] %v948_v56  ;;  %v900_v60 = vpop.xlane.xlu1 %899 }
 0x549   :  { %961 = vst [vmem:[#allocation11] sm:$0xff] %v945_v57  ;;  %v918_v61 = vmul.f32 0.6931472, %v1524_v59  ;;  %1533 = vlog2.f32 %v900_v60  ;;  %v898_v19 = vpop.xlane.xlu0 %897 }
 0x54a   :  { %1535 = vlog2.f32 %v898_v19 }
 0x54b   :  { %v1526_v62 = vpop.eup %1525  ;;  %v947_v22 = vsub.f32 %v1877_v45, %v918_v61 }
 0x54c   :  { %v1528_v23 = vpop.eup %1527  ;;  %v924_v25 = vmul.f32 0.6931472, %v1526_v62  ;;  %v904_v26 = vpop.xlane.xlu1 %903 }
 0x54d   :  { %963 = vst [vmem:[#allocation11 + $0x10] sm:$0xff] %v947_v22  ;;  %v922_v27 = vmul.f32 0.6931472, %v1528_v23  ;;  %1537 = vlog2.f32 %v904_v26  ;;  %v902_v38 = vpop.xlane.xlu0 %901 }
 0x54e   :  { %v950_v39 = vsub.f32 %v1882_v50, %v924_v25  ;;  %1539 = vlog2.f32 %v902_v38 }
 0x54f   :  { %v1530_v29 = vpop.eup %1529  ;;  %v949_v30 = vsub.f32 %v1879_v47, %v922_v27 }
 0x550   :  { %v1532_v32 = vpop.eup %1531  ;;  %966 = vst [vmem:[#allocation11 + $0x28] sm:$0xff] %v950_v39  ;;  %v928_v33 = vmul.f32 0.6931472, %v1530_v29  ;;  %v908_v34 = vpop.xlane.xlu1 %907 }
 0x551   :  { %965 = vst [vmem:[#allocation11 + $0x20] sm:$0xff] %v949_v30  ;;  %v926_v35 = vmul.f32 0.6931472, %v1532_v32  ;;  %1541 = vlog2.f32 %v908_v34  ;;  %v906_v45 = vpop.xlane.xlu0 %905 }
 0x552   :  { %v952_v0 = vsub.f32 %v1888_v55, %v928_v33  ;;  %1543 = vlog2.f32 %v906_v45 }
 0x553   :  { %v1534_v1 = vpop.eup %1533  ;;  %v951_v3 = vsub.f32 %v1885_v40, %v926_v35 }
 0x554   :  { %v1536_v4 = vpop.eup %1535  ;;  %968 = vst [vmem:[#allocation11 + $0x38] sm:$0xff] %v952_v0  ;;  %v932_v50 = vmul.f32 0.6931472, %v1534_v1  ;;  %v912_v5 = vpop.xlane.xlu1 %911 }
 0x555   :  { %967 = vst [vmem:[#allocation11 + $0x30] sm:$0xff] %v951_v3  ;;  %v930_v47 = vmul.f32 0.6931472, %v1536_v4  ;;  %1545 = vlog2.f32 %v912_v5  ;;  %v910_v6 = vpop.xlane.xlu0 %909 }
 0x556   :  { %v954_v8 = vsub.f32 %v1894_v63, %v932_v50  ;;  %1547 = vlog2.f32 %v910_v6 }
 0x557   :  { %v1538_v9 = vpop.eup %1537  ;;  %v953_v10 = vsub.f32 %v1891_v58, %v930_v47 }
 0x558   :  { %v1540_v11 = vpop.eup %1539  ;;  %970 = vst [vmem:[#allocation11 + $0x48] sm:$0xff] %v954_v8  ;;  %v936_v55 = vmul.f32 0.6931472, %v1538_v9 }
 0x559   :  { %969 = vst [vmem:[#allocation11 + $0x40] sm:$0xff] %v953_v10  ;;  %v934_v12 = vmul.f32 0.6931472, %v1540_v11 }
 0x55a   :  { %v956_v40 = vsub.f32 %v1901_v28, %v936_v55 }
 0x55b   :  { %v1542_v13 = vpop.eup %1541  ;;  %v955_v14 = vsub.f32 %v1897_v24, %v934_v12 }
 0x55c   :  { %v1544_v15 = vpop.eup %1543  ;;  %972 = vst [vmem:[#allocation11 + $0x58] sm:$0xff] %v956_v40  ;;  %v940_v16 = vmul.f32 0.6931472, %v1542_v13 }
 0x55d   :  { %971 = vst [vmem:[#allocation11 + $0x50] sm:$0xff] %v955_v14  ;;  %v938_v17 = vmul.f32 0.6931472, %v1544_v15 }
 0x55e   :  { %v958_v63 = vsub.f32 %v1909_v36, %v940_v16 }
 0x55f   :  { %v1546_v18 = vpop.eup %1545  ;;  %v957_v58 = vsub.f32 %v1905_v31, %v938_v17 }
 0x560   :  { %v1548_v20 = vpop.eup %1547  ;;  %974 = vst [vmem:[#allocation11 + $0x68] sm:$0xff] %v958_v63  ;;  %v944_v21 = vmul.f32 0.6931472, %v1546_v18 }
 0x561   :  { %973 = vst [vmem:[#allocation11 + $0x60] sm:$0xff] %v957_v58  ;;  %v942_v28 = vmul.f32 0.6931472, %v1548_v20 }
 0x562   :  { %v960_v37 = vsub.f32 %v1917_v7, %v944_v21 }
 0x563   :  { %v959_v24 = vsub.f32 %v1913_v2, %v942_v28 }
 0x564   :  { %976 = vst [vmem:[#allocation11 + $0x78] sm:$0xff] %v960_v37 }
 0x565   :  { %975 = vst [vmem:[#allocation11 + $0x70] sm:$0xff] %v959_v24 }
 0x566   :  { %1648 = shalt.err (!%p1645_p8)
}
 0x567   :  { %s1649_s28 = scalar_lea.hbm %s1958_s6, 2048 }
 0x568   :  { %p1650_p9 = scmp.ne.s32.totalorder %s1958_s6, %s1649_s28  ;;  %p1653_p10 = scmp.lt.u32.totalorder %s1649_s28, %s1958_s6 }
 0x56a   :  { %p1655_p11 = pnand %p1653_p10, %p1650_p9 }
 0x56c   :  { %1658 = shalt.err (!%p1655_p11)
}
 0x56d   :  { %988 = dma.vmem_to_hbm [thread:$0]  %s983_s23, 2048, %s1958_s6, [#allocation5], %s1669_s9, %s1669_s9, %s1670_s10  }
 0x56e   :  { %1665 = dma.done.wait [#allocation5], 2048  }
 0x56f   :  { %1666 = vsyncadd [#allocation5], 4294965248 }
 0x570   :  { %992 = vsyncpa [#allocation4], 1 }
 0x571   :  { %993 = vsyncpa [#allocation7], 1 }
 0x572   :  { %994 = vsyncpa [#allocation10], 1 }
 0x573   :  { %995 = vsyncpa [#allocation5], 1 }

</bundles_post_ra>
